<compile_context>
chip_gen: v6e
topology: v6e:2x2x1
jax: 0.10.0
libtpu: 0.0.40
codegen_flags: <defaults>
</compile_context>

<pallas_src>
import functools

import jax
import jax.numpy as jnp
from jax.experimental import pallas as pl
from jax.experimental.pallas import tpu as pltpu


# ----------------------------------------------------------------------------
# Fused Inception kernel (one grid step = one batch element)
# ----------------------------------------------------------------------------
def _inception_kernel(x_ref, wcat_ref, bcat_ref,
                      w3_ref, bias3_ref, w5_ref, bias5_ref,
                      w4_ref, bias4_ref, o_ref,
                      t2pad_ref, t3pad_ref, xmax_ref,
                      *, ch1x1, ch3x3red, ch3x3, ch5x5red, ch5x5, pool_proj):
    L = o_ref.shape[1]
    x = x_ref[0]                                   # (L, Cin), f32

    # --- branch1 / branch2-reduce / branch3-reduce: one fused 1x1 matmul ----
    y = jnp.dot(x, wcat_ref[...], preferred_element_type=jnp.float32)
    y = jnp.maximum(y + bcat_ref[0][None, :], 0.0)
    br1 = y[:, 0:ch1x1]
    t2 = y[:, ch1x1:ch1x1 + ch3x3red]
    t3 = y[:, ch1x1 + ch3x3red:ch1x1 + ch3x3red + ch5x5red]

    # --- branch2: conv(k=3, padding=1) + ReLU (zero halo in VMEM scratch) ---
    t2pad_ref[...] = jnp.zeros_like(t2pad_ref)
    t2pad_ref[1:L + 1, :] = t2
    acc2 = jnp.zeros((L, ch3x3), jnp.float32)
    for k in range(3):                             # static unroll
        acc2 = acc2 + jnp.dot(t2pad_ref[k:k + L, :], w3_ref[k],
                              preferred_element_type=jnp.float32)
    br2 = jnp.maximum(acc2 + bias3_ref[0][None, :], 0.0)

    # --- branch3: conv(k=5, padding=2) + ReLU -------------------------------
    t3pad_ref[...] = jnp.zeros_like(t3pad_ref)
    t3pad_ref[2:L + 2, :] = t3
    acc3 = jnp.zeros((L, ch5x5), jnp.float32)
    for k in range(5):                             # static unroll
        acc3 = acc3 + jnp.dot(t3pad_ref[k:k + L, :], w5_ref[k],
                              preferred_element_type=jnp.float32)
    br3 = jnp.maximum(acc3 + bias5_ref[0][None, :], 0.0)

    # --- branch4: maxpool(k=3, s=1, p=1) + 1x1 conv + ReLU ------------------
    # replicate-edge halo is equivalent to -inf padding for a max reduction
    xmax_ref[1:L + 1, :] = x
    xmax_ref[0:1, :] = x[0:1, :]
    xmax_ref[L + 1:L + 2, :] = x[L - 1:L, :]
    pooled = jnp.maximum(jnp.maximum(xmax_ref[0:L, :], xmax_ref[1:L + 1, :]),
                         xmax_ref[2:L + 2, :])
    br4 = jnp.dot(pooled, w4_ref[...], preferred_element_type=jnp.float32)
    br4 = jnp.maximum(br4 + bias4_ref[0][None, :], 0.0)

    # --- lane-dense concatenated output slab --------------------------------
    c0 = 0
    o_ref[0, :, c0:c0 + ch1x1] = br1.astype(o_ref.dtype)
    c0 += ch1x1
    o_ref[0, :, c0:c0 + ch3x3] = br2.astype(o_ref.dtype)
    c0 += ch3x3
    o_ref[0, :, c0:c0 + ch5x5] = br3.astype(o_ref.dtype)
    c0 += ch5x5
    o_ref[0, :, c0:c0 + pool_proj] = br4.astype(o_ref.dtype)


# ----------------------------------------------------------------------------
# Wrapper (layout transposes, weight packing, BlockSpecs)
# ----------------------------------------------------------------------------
def inception_forward(x_ncl, params):
    """Fused Inception forward. x_ncl: (B, Cin, L) NCL; returns (B, Ctot, L)."""
    B, Cin, L = x_ncl.shape
    w1, bb1 = params["b1"]
    w2r, bb2r = params["b2_red"]
    w3, bb3 = params["b2"]
    w3r, bb3r = params["b3_red"]
    w5, bb5 = params["b3"]
    w4, bb4 = params["b4"]

    ch1x1 = w1.shape[-1]
    ch3x3red = w2r.shape[-1]
    ch3x3 = w3.shape[-1]
    ch5x5red = w3r.shape[-1]
    ch5x5 = w5.shape[-1]
    pool_proj = w4.shape[-1]
    Ccat = ch1x1 + ch3x3red + ch5x5red
    Ctot = ch1x1 + ch3x3 + ch5x5 + pool_proj

    # pack the three shared-input 1x1 convs into one wide matmul
    wcat = jnp.concatenate([w1[0], w2r[0], w3r[0]], axis=-1)     # (Cin, Ccat)
    bcat = jnp.concatenate([bb1, bb2r, bb3r]).reshape(1, Ccat)

    x = jnp.transpose(x_ncl, (0, 2, 1))  # NCL -> BLC

    kernel = functools.partial(
        _inception_kernel, ch1x1=ch1x1, ch3x3red=ch3x3red, ch3x3=ch3x3,
        ch5x5red=ch5x5red, ch5x5=ch5x5, pool_proj=pool_proj)

    out_blc = pl.pallas_call(
        kernel,
        out_shape=jax.ShapeDtypeStruct((B, L, Ctot), x.dtype),
        grid=(B,),
        in_specs=[
            pl.BlockSpec((1, L, Cin), lambda b: (b, 0, 0)),
            pl.BlockSpec((Cin, Ccat), lambda b: (0, 0)),
            pl.BlockSpec((1, Ccat), lambda b: (0, 0)),
            pl.BlockSpec((3, ch3x3red, ch3x3), lambda b: (0, 0, 0)),
            pl.BlockSpec((1, ch3x3), lambda b: (0, 0)),
            pl.BlockSpec((5, ch5x5red, ch5x5), lambda b: (0, 0, 0)),
            pl.BlockSpec((1, ch5x5), lambda b: (0, 0)),
            pl.BlockSpec((Cin, pool_proj), lambda b: (0, 0)),
            pl.BlockSpec((1, pool_proj), lambda b: (0, 0)),
        ],
        out_specs=pl.BlockSpec((1, L, Ctot), lambda b: (b, 0, 0)),
        scratch_shapes=[
            pltpu.VMEM((L + 2, ch3x3red), jnp.float32),   # zero-padded t2
            pltpu.VMEM((L + 4, ch5x5red), jnp.float32),   # zero-padded t3
            pltpu.VMEM((L + 2, Cin), jnp.float32),        # edge-padded x (pool)
        ],
        compiler_params=pltpu.CompilerParams(
            dimension_semantics=("parallel",)),
    )(x, wcat, bcat, w3, bb3.reshape(1, ch3x3), w5, bb5.reshape(1, ch5x5),
      w4[0], bb4.reshape(1, pool_proj))

    return jnp.transpose(out_blc, (0, 2, 1))  # BLC -> NCL


# ----------------------------------------------------------------------------
# Parameter init (deterministic, PyTorch Conv1d shapes: (Cout, Cin, K))
# ----------------------------------------------------------------------------
def init_conv(key, cin, cout, k):
    kw, kb = jax.random.split(key)
    fan_in = cin * k
    bound = 1.0 / jnp.sqrt(fan_in)
    w_oik = jax.random.uniform(kw, (cout, cin, k), jnp.float32, -bound, bound)
    b = jax.random.uniform(kb, (cout,), jnp.float32, -bound, bound)
    # transpose to kernel layout (K, Cin, Cout)
    return jnp.transpose(w_oik, (2, 1, 0)), b


def init_inception(key, in_channels, ch1x1, ch3x3red, ch3x3,
                   ch5x5red, ch5x5, pool_proj):
    ks = jax.random.split(key, 6)
    return {
        "b1":     init_conv(ks[0], in_channels, ch1x1, 1),
        "b2_red": init_conv(ks[1], in_channels, ch3x3red, 1),
        "b2":     init_conv(ks[2], ch3x3red, ch3x3, 3),
        "b3_red": init_conv(ks[3], in_channels, ch5x5red, 1),
        "b3":     init_conv(ks[4], ch5x5red, ch5x5, 5),
        "b4":     init_conv(ks[5], in_channels, pool_proj, 1),
    }


# ----------------------------------------------------------------------------
# Pure-JAX reference (for correctness check)
# ----------------------------------------------------------------------------
def _ref_conv1d_relu(x_blc, w_kio, bias, padding):
    xp = jnp.pad(x_blc, ((0, 0), (padding, padding), (0, 0)))
    K = w_kio.shape[0]
    L = x_blc.shape[1]
    out = sum(jnp.einsum("blc,cd->bld", xp[:, k:k + L, :], w_kio[k])
              for k in range(K)) + bias
    return jnp.maximum(out, 0.0)


def _ref_inception(x_ncl, params):
    x = jnp.transpose(x_ncl, (0, 2, 1))
    b1 = _ref_conv1d_relu(x, *params["b1"], 0)
    b2 = _ref_conv1d_relu(_ref_conv1d_relu(x, *params["b2_red"], 0),
                          *params["b2"], 1)
    b3 = _ref_conv1d_relu(_ref_conv1d_relu(x, *params["b3_red"], 0),
                          *params["b3"], 2)
    xp = jnp.pad(x, ((0, 0), (1, 1), (0, 0)), constant_values=-jnp.inf)
    L = x.shape[1]
    pooled = jnp.maximum(jnp.maximum(xp[:, 0:L], xp[:, 1:L + 1]),
                         xp[:, 2:L + 2])
    b4 = _ref_conv1d_relu(pooled, *params["b4"], 0)
    return jnp.transpose(jnp.concatenate([b1, b2, b3, b4], axis=-1),
                         (0, 2, 1))


# ----------------------------------------------------------------------------
if __name__ == "__main__":
    key = jax.random.PRNGKey(0)
    kx, kp = jax.random.split(key)

    B, Cin, L = 2, 8, 16
    ch1x1, ch3x3red, ch3x3, ch5x5red, ch5x5, pool_proj = 8, 4, 8, 4, 8, 8

    params = init_inception(kp, Cin, ch1x1, ch3x3red, ch3x3,
                            ch5x5red, ch5x5, pool_proj)
    x = jax.random.normal(kx, (B, Cin, L), jnp.float32)  # NCL, like PyTorch

    out = inception_forward(x, params)
    out = jax.block_until_ready(out)

    expected_channels = ch1x1 + ch3x3 + ch5x5 + pool_proj
    assert out.shape == (B, expected_channels, L), out.shape

    ref = _ref_inception(x, params)
    assert jnp.allclose(out, ref, atol=1e-4, rtol=1e-4), \
        float(jnp.max(jnp.abs(out - ref)))

    print("KERNEL_OK")
</pallas_src>

<mosaic_0001>
module attributes {stable_mosaic.version = 11 : i64} {
  func.func @_inception_kernel(%arg0: i32, %arg1: memref<1x16x8xf32, #tpu.memory_space<vmem>>, %arg2: memref<8x16xf32, #tpu.memory_space<vmem>>, %arg3: memref<1x16xf32, #tpu.memory_space<vmem>>, %arg4: memref<3x4x8xf32, #tpu.memory_space<vmem>>, %arg5: memref<1x8xf32, #tpu.memory_space<vmem>>, %arg6: memref<5x4x8xf32, #tpu.memory_space<vmem>>, %arg7: memref<1x8xf32, #tpu.memory_space<vmem>>, %arg8: memref<8x8xf32, #tpu.memory_space<vmem>>, %arg9: memref<1x8xf32, #tpu.memory_space<vmem>>, %arg10: memref<1x16x32xf32, #tpu.memory_space<vmem>>, %arg11: memref<18x4xf32, #tpu.memory_space<vmem>>, %arg12: memref<20x4xf32, #tpu.memory_space<vmem>>, %arg13: memref<18x8xf32, #tpu.memory_space<vmem>>) attributes {dimension_semantics = [#tpu.dimension_semantics<parallel>], iteration_bounds = array<i64: 2>, scalar_prefetch = 0 : i64, scratch_operands = 3 : i64, tpu.core_type = #tpu.core_type<tc>, window_params = [{transform_indices = @transform_0, window_bounds = array<i64: 1, 16, 8>}, {pipeline_mode = #tpu.pipeline_mode<synchronous>, transform_indices = @transform_1, window_bounds = array<i64: 8, 16>}, {pipeline_mode = #tpu.pipeline_mode<synchronous>, transform_indices = @transform_2, window_bounds = array<i64: 1, 16>}, {pipeline_mode = #tpu.pipeline_mode<synchronous>, transform_indices = @transform_3, window_bounds = array<i64: 3, 4, 8>}, {pipeline_mode = #tpu.pipeline_mode<synchronous>, transform_indices = @transform_4, window_bounds = array<i64: 1, 8>}, {pipeline_mode = #tpu.pipeline_mode<synchronous>, transform_indices = @transform_5, window_bounds = array<i64: 5, 4, 8>}, {pipeline_mode = #tpu.pipeline_mode<synchronous>, transform_indices = @transform_6, window_bounds = array<i64: 1, 8>}, {pipeline_mode = #tpu.pipeline_mode<synchronous>, transform_indices = @transform_7, window_bounds = array<i64: 8, 8>}, {pipeline_mode = #tpu.pipeline_mode<synchronous>, transform_indices = @transform_8, window_bounds = array<i64: 1, 8>}, {transform_indices = @transform_9, window_bounds = array<i64: 1, 16, 32>}]} {
    %c0 = arith.constant 0 : index
    %c0_0 = arith.constant 0 : index
    %c0_1 = arith.constant 0 : index
    %0 = vector.load %arg1[%c0, %c0_0, %c0_1] : memref<1x16x8xf32, #tpu.memory_space<vmem>>, vector<1x16x8xf32>
    %1 = vector.shape_cast %0 : vector<1x16x8xf32> to vector<16x8xf32>
    %c0_2 = arith.constant 0 : index
    %c0_3 = arith.constant 0 : index
    %2 = vector.load %arg2[%c0_2, %c0_3] : memref<8x16xf32, #tpu.memory_space<vmem>>, vector<8x16xf32>
    %cst = arith.constant dense<0.000000e+00> : vector<16x16xf32>
    %3 = tpu.matmul %1, %2, %cst {dimension_numbers = #tpu.dot_dimension_numbers<[1], [0], [0], [1], [0, 0, 1, 1], [], []>} : vector<16x8xf32>, vector<8x16xf32>, vector<16x16xf32> -> vector<16x16xf32>
    %c0_4 = arith.constant 0 : index
    %c0_5 = arith.constant 0 : index
    %4 = vector.load %arg3[%c0_4, %c0_5] : memref<1x16xf32, #tpu.memory_space<vmem>>, vector<1x16xf32>
    %5 = vector.shape_cast %4 : vector<1x16xf32> to vector<16xf32>
    %6 = vector.shape_cast %5 : vector<16xf32> to vector<1x16xf32>
    %7 = vector.broadcast %6 : vector<1x16xf32> to vector<16x16xf32>
    %8 = arith.addf %3, %7 : vector<16x16xf32>
    %cst_6 = arith.constant 0.000000e+00 : f32
    %9 = vector.broadcast %cst_6 : f32 to vector<16x16xf32>
    %10 = arith.maximumf %8, %9 : vector<16x16xf32>
    %11 = vector.extract_strided_slice %10 {offsets = [0, 0], sizes = [16, 8], strides = [1, 1]} : vector<16x16xf32> to vector<16x8xf32>
    %12 = vector.extract_strided_slice %10 {offsets = [0, 8], sizes = [16, 4], strides = [1, 1]} : vector<16x16xf32> to vector<16x4xf32>
    %13 = vector.extract_strided_slice %10 {offsets = [0, 12], sizes = [16, 4], strides = [1, 1]} : vector<16x16xf32> to vector<16x4xf32>
    %cst_7 = arith.constant 0.000000e+00 : f32
    %14 = vector.broadcast %cst_7 : f32 to vector<18x4xf32>
    %c0_8 = arith.constant 0 : index
    %c0_9 = arith.constant 0 : index
    %15 = vector.load %arg11[%c0_8, %c0_9] : memref<18x4xf32, #tpu.memory_space<vmem>>, vector<18x4xf32>
    tpu.vector_store %arg11[%c0_8, %c0_9], %14 {strides = array<i32>} : memref<18x4xf32, #tpu.memory_space<vmem>>, vector<18x4xf32>,
    %c1 = arith.constant 1 : index
    %c0_10 = arith.constant 0 : index
    %16 = vector.load %arg11[%c1, %c0_10] : memref<18x4xf32, #tpu.memory_space<vmem>>, vector<16x4xf32>
    tpu.vector_store %arg11[%c1, %c0_10], %12 {strides = array<i32>} : memref<18x4xf32, #tpu.memory_space<vmem>>, vector<16x4xf32>,
    %cst_11 = arith.constant 0.000000e+00 : f32
    %17 = vector.broadcast %cst_11 : f32 to vector<16x8xf32>
    %c0_12 = arith.constant 0 : index
    %c0_13 = arith.constant 0 : index
    %18 = vector.load %arg11[%c0_12, %c0_13] : memref<18x4xf32, #tpu.memory_space<vmem>>, vector<16x4xf32>
    %c0_14 = arith.constant 0 : index
    %c0_15 = arith.constant 0 : index
    %c0_16 = arith.constant 0 : index
    %19 = vector.load %arg4[%c0_14, %c0_15, %c0_16] : memref<3x4x8xf32, #tpu.memory_space<vmem>>, vector<1x4x8xf32>
    %20 = vector.shape_cast %19 : vector<1x4x8xf32> to vector<4x8xf32>
    %cst_17 = arith.constant dense<0.000000e+00> : vector<16x8xf32>
    %21 = tpu.matmul %18, %20, %cst_17 {dimension_numbers = #tpu.dot_dimension_numbers<[1], [0], [0], [1], [0, 0, 1, 1], [], []>} : vector<16x4xf32>, vector<4x8xf32>, vector<16x8xf32> -> vector<16x8xf32>
    %22 = arith.addf %17, %21 : vector<16x8xf32>
    %c1_18 = arith.constant 1 : index
    %c0_19 = arith.constant 0 : index
    %23 = vector.load %arg11[%c1_18, %c0_19] : memref<18x4xf32, #tpu.memory_space<vmem>>, vector<16x4xf32>
    %c1_20 = arith.constant 1 : index
    %c0_21 = arith.constant 0 : index
    %c0_22 = arith.constant 0 : index
    %24 = vector.load %arg4[%c1_20, %c0_21, %c0_22] : memref<3x4x8xf32, #tpu.memory_space<vmem>>, vector<1x4x8xf32>
    %25 = vector.shape_cast %24 : vector<1x4x8xf32> to vector<4x8xf32>
    %cst_23 = arith.constant dense<0.000000e+00> : vector<16x8xf32>
    %26 = tpu.matmul %23, %25, %cst_23 {dimension_numbers = #tpu.dot_dimension_numbers<[1], [0], [0], [1], [0, 0, 1, 1], [], []>} : vector<16x4xf32>, vector<4x8xf32>, vector<16x8xf32> -> vector<16x8xf32>
    %27 = arith.addf %22, %26 : vector<16x8xf32>
    %c2 = arith.constant 2 : index
    %c0_24 = arith.constant 0 : index
    %28 = vector.load %arg11[%c2, %c0_24] : memref<18x4xf32, #tpu.memory_space<vmem>>, vector<16x4xf32>
    %c2_25 = arith.constant 2 : index
    %c0_26 = arith.constant 0 : index
    %c0_27 = arith.constant 0 : index
    %29 = vector.load %arg4[%c2_25, %c0_26, %c0_27] : memref<3x4x8xf32, #tpu.memory_space<vmem>>, vector<1x4x8xf32>
    %30 = vector.shape_cast %29 : vector<1x4x8xf32> to vector<4x8xf32>
    %cst_28 = arith.constant dense<0.000000e+00> : vector<16x8xf32>
    %31 = tpu.matmul %28, %30, %cst_28 {dimension_numbers = #tpu.dot_dimension_numbers<[1], [0], [0], [1], [0, 0, 1, 1], [], []>} : vector<16x4xf32>, vector<4x8xf32>, vector<16x8xf32> -> vector<16x8xf32>
    %32 = arith.addf %27, %31 : vector<16x8xf32>
    %c0_29 = arith.constant 0 : index
    %c0_30 = arith.constant 0 : index
    %33 = vector.load %arg5[%c0_29, %c0_30] : memref<1x8xf32, #tpu.memory_space<vmem>>, vector<1x8xf32>
    %34 = vector.shape_cast %33 : vector<1x8xf32> to vector<8xf32>
    %35 = vector.shape_cast %34 : vector<8xf32> to vector<1x8xf32>
    %36 = vector.broadcast %35 : vector<1x8xf32> to vector<16x8xf32>
    %37 = arith.addf %32, %36 : vector<16x8xf32>
    %cst_31 = arith.constant 0.000000e+00 : f32
    %38 = vector.broadcast %cst_31 : f32 to vector<16x8xf32>
    %39 = arith.maximumf %37, %38 : vector<16x8xf32>
    %cst_32 = arith.constant 0.000000e+00 : f32
    %40 = vector.broadcast %cst_32 : f32 to vector<20x4xf32>
    %c0_33 = arith.constant 0 : index
    %c0_34 = arith.constant 0 : index
    %41 = vector.load %arg12[%c0_33, %c0_34] : memref<20x4xf32, #tpu.memory_space<vmem>>, vector<20x4xf32>
    tpu.vector_store %arg12[%c0_33, %c0_34], %40 {strides = array<i32>} : memref<20x4xf32, #tpu.memory_space<vmem>>, vector<20x4xf32>,
    %c2_35 = arith.constant 2 : index
    %c0_36 = arith.constant 0 : index
    %42 = vector.load %arg12[%c2_35, %c0_36] : memref<20x4xf32, #tpu.memory_space<vmem>>, vector<16x4xf32>
    tpu.vector_store %arg12[%c2_35, %c0_36], %13 {strides = array<i32>} : memref<20x4xf32, #tpu.memory_space<vmem>>, vector<16x4xf32>,
    %cst_37 = arith.constant 0.000000e+00 : f32
    %43 = vector.broadcast %cst_37 : f32 to vector<16x8xf32>
    %c0_38 = arith.constant 0 : index
    %c0_39 = arith.constant 0 : index
    %44 = vector.load %arg12[%c0_38, %c0_39] : memref<20x4xf32, #tpu.memory_space<vmem>>, vector<16x4xf32>
    %c0_40 = arith.constant 0 : index
    %c0_41 = arith.constant 0 : index
    %c0_42 = arith.constant 0 : index
    %45 = vector.load %arg6[%c0_40, %c0_41, %c0_42] : memref<5x4x8xf32, #tpu.memory_space<vmem>>, vector<1x4x8xf32>
    %46 = vector.shape_cast %45 : vector<1x4x8xf32> to vector<4x8xf32>
    %cst_43 = arith.constant dense<0.000000e+00> : vector<16x8xf32>
    %47 = tpu.matmul %44, %46, %cst_43 {dimension_numbers = #tpu.dot_dimension_numbers<[1], [0], [0], [1], [0, 0, 1, 1], [], []>} : vector<16x4xf32>, vector<4x8xf32>, vector<16x8xf32> -> vector<16x8xf32>
    %48 = arith.addf %43, %47 : vector<16x8xf32>
    %c1_44 = arith.constant 1 : index
    %c0_45 = arith.constant 0 : index
    %49 = vector.load %arg12[%c1_44, %c0_45] : memref<20x4xf32, #tpu.memory_space<vmem>>, vector<16x4xf32>
    %c1_46 = arith.constant 1 : index
    %c0_47 = arith.constant 0 : index
    %c0_48 = arith.constant 0 : index
    %50 = vector.load %arg6[%c1_46, %c0_47, %c0_48] : memref<5x4x8xf32, #tpu.memory_space<vmem>>, vector<1x4x8xf32>
    %51 = vector.shape_cast %50 : vector<1x4x8xf32> to vector<4x8xf32>
    %cst_49 = arith.constant dense<0.000000e+00> : vector<16x8xf32>
    %52 = tpu.matmul %49, %51, %cst_49 {dimension_numbers = #tpu.dot_dimension_numbers<[1], [0], [0], [1], [0, 0, 1, 1], [], []>} : vector<16x4xf32>, vector<4x8xf32>, vector<16x8xf32> -> vector<16x8xf32>
    %53 = arith.addf %48, %52 : vector<16x8xf32>
    %c2_50 = arith.constant 2 : index
    %c0_51 = arith.constant 0 : index
    %54 = vector.load %arg12[%c2_50, %c0_51] : memref<20x4xf32, #tpu.memory_space<vmem>>, vector<16x4xf32>
    %c2_52 = arith.constant 2 : index
    %c0_53 = arith.constant 0 : index
    %c0_54 = arith.constant 0 : index
    %55 = vector.load %arg6[%c2_52, %c0_53, %c0_54] : memref<5x4x8xf32, #tpu.memory_space<vmem>>, vector<1x4x8xf32>
    %56 = vector.shape_cast %55 : vector<1x4x8xf32> to vector<4x8xf32>
    %cst_55 = arith.constant dense<0.000000e+00> : vector<16x8xf32>
    %57 = tpu.matmul %54, %56, %cst_55 {dimension_numbers = #tpu.dot_dimension_numbers<[1], [0], [0], [1], [0, 0, 1, 1], [], []>} : vector<16x4xf32>, vector<4x8xf32>, vector<16x8xf32> -> vector<16x8xf32>
    %58 = arith.addf %53, %57 : vector<16x8xf32>
    %c3 = arith.constant 3 : index
    %c0_56 = arith.constant 0 : index
    %59 = vector.load %arg12[%c3, %c0_56] : memref<20x4xf32, #tpu.memory_space<vmem>>, vector<16x4xf32>
    %c3_57 = arith.constant 3 : index
    %c0_58 = arith.constant 0 : index
    %c0_59 = arith.constant 0 : index
    %60 = vector.load %arg6[%c3_57, %c0_58, %c0_59] : memref<5x4x8xf32, #tpu.memory_space<vmem>>, vector<1x4x8xf32>
    %61 = vector.shape_cast %60 : vector<1x4x8xf32> to vector<4x8xf32>
    %cst_60 = arith.constant dense<0.000000e+00> : vector<16x8xf32>
    %62 = tpu.matmul %59, %61, %cst_60 {dimension_numbers = #tpu.dot_dimension_numbers<[1], [0], [0], [1], [0, 0, 1, 1], [], []>} : vector<16x4xf32>, vector<4x8xf32>, vector<16x8xf32> -> vector<16x8xf32>
    %63 = arith.addf %58, %62 : vector<16x8xf32>
    %c4 = arith.constant 4 : index
    %c0_61 = arith.constant 0 : index
    %64 = vector.load %arg12[%c4, %c0_61] : memref<20x4xf32, #tpu.memory_space<vmem>>, vector<16x4xf32>
    %c4_62 = arith.constant 4 : index
    %c0_63 = arith.constant 0 : index
    %c0_64 = arith.constant 0 : index
    %65 = vector.load %arg6[%c4_62, %c0_63, %c0_64] : memref<5x4x8xf32, #tpu.memory_space<vmem>>, vector<1x4x8xf32>
    %66 = vector.shape_cast %65 : vector<1x4x8xf32> to vector<4x8xf32>
    %cst_65 = arith.constant dense<0.000000e+00> : vector<16x8xf32>
    %67 = tpu.matmul %64, %66, %cst_65 {dimension_numbers = #tpu.dot_dimension_numbers<[1], [0], [0], [1], [0, 0, 1, 1], [], []>} : vector<16x4xf32>, vector<4x8xf32>, vector<16x8xf32> -> vector<16x8xf32>
    %68 = arith.addf %63, %67 : vector<16x8xf32>
    %c0_66 = arith.constant 0 : index
    %c0_67 = arith.constant 0 : index
    %69 = vector.load %arg7[%c0_66, %c0_67] : memref<1x8xf32, #tpu.memory_space<vmem>>, vector<1x8xf32>
    %70 = vector.shape_cast %69 : vector<1x8xf32> to vector<8xf32>
    %71 = vector.shape_cast %70 : vector<8xf32> to vector<1x8xf32>
    %72 = vector.broadcast %71 : vector<1x8xf32> to vector<16x8xf32>
    %73 = arith.addf %68, %72 : vector<16x8xf32>
    %cst_68 = arith.constant 0.000000e+00 : f32
    %74 = vector.broadcast %cst_68 : f32 to vector<16x8xf32>
    %75 = arith.maximumf %73, %74 : vector<16x8xf32>
    %c1_69 = arith.constant 1 : index
    %c0_70 = arith.constant 0 : index
    %76 = vector.load %arg13[%c1_69, %c0_70] : memref<18x8xf32, #tpu.memory_space<vmem>>, vector<16x8xf32>
    tpu.vector_store %arg13[%c1_69, %c0_70], %1 {strides = array<i32>} : memref<18x8xf32, #tpu.memory_space<vmem>>, vector<16x8xf32>,
    %77 = vector.extract_strided_slice %1 {offsets = [0, 0], sizes = [1, 8], strides = [1, 1]} : vector<16x8xf32> to vector<1x8xf32>
    %c0_71 = arith.constant 0 : index
    %c0_72 = arith.constant 0 : index
    %78 = vector.load %arg13[%c0_71, %c0_72] : memref<18x8xf32, #tpu.memory_space<vmem>>, vector<1x8xf32>
    tpu.vector_store %arg13[%c0_71, %c0_72], %77 {strides = array<i32>} : memref<18x8xf32, #tpu.memory_space<vmem>>, vector<1x8xf32>,
    %79 = vector.extract_strided_slice %1 {offsets = [15, 0], sizes = [1, 8], strides = [1, 1]} : vector<16x8xf32> to vector<1x8xf32>
    %c17 = arith.constant 17 : index
    %c0_73 = arith.constant 0 : index
    %80 = vector.load %arg13[%c17, %c0_73] : memref<18x8xf32, #tpu.memory_space<vmem>>, vector<1x8xf32>
    tpu.vector_store %arg13[%c17, %c0_73], %79 {strides = array<i32>} : memref<18x8xf32, #tpu.memory_space<vmem>>, vector<1x8xf32>,
    %c0_74 = arith.constant 0 : index
    %c0_75 = arith.constant 0 : index
    %81 = vector.load %arg13[%c0_74, %c0_75] : memref<18x8xf32, #tpu.memory_space<vmem>>, vector<16x8xf32>
    %c1_76 = arith.constant 1 : index
    %c0_77 = arith.constant 0 : index
    %82 = vector.load %arg13[%c1_76, %c0_77] : memref<18x8xf32, #tpu.memory_space<vmem>>, vector<16x8xf32>
    %83 = arith.maximumf %81, %82 : vector<16x8xf32>
    %c2_78 = arith.constant 2 : index
    %c0_79 = arith.constant 0 : index
    %84 = vector.load %arg13[%c2_78, %c0_79] : memref<18x8xf32, #tpu.memory_space<vmem>>, vector<16x8xf32>
    %85 = arith.maximumf %83, %84 : vector<16x8xf32>
    %c0_80 = arith.constant 0 : index
    %c0_81 = arith.constant 0 : index
    %86 = vector.load %arg8[%c0_80, %c0_81] : memref<8x8xf32, #tpu.memory_space<vmem>>, vector<8x8xf32>
    %cst_82 = arith.constant dense<0.000000e+00> : vector<16x8xf32>
    %87 = tpu.matmul %85, %86, %cst_82 {dimension_numbers = #tpu.dot_dimension_numbers<[1], [0], [0], [1], [0, 0, 1, 1], [], []>} : vector<16x8xf32>, vector<8x8xf32>, vector<16x8xf32> -> vector<16x8xf32>
    %c0_83 = arith.constant 0 : index
    %c0_84 = arith.constant 0 : index
    %88 = vector.load %arg9[%c0_83, %c0_84] : memref<1x8xf32, #tpu.memory_space<vmem>>, vector<1x8xf32>
    %89 = vector.shape_cast %88 : vector<1x8xf32> to vector<8xf32>
    %90 = vector.shape_cast %89 : vector<8xf32> to vector<1x8xf32>
    %91 = vector.broadcast %90 : vector<1x8xf32> to vector<16x8xf32>
    %92 = arith.addf %87, %91 : vector<16x8xf32>
    %cst_85 = arith.constant 0.000000e+00 : f32
    %93 = vector.broadcast %cst_85 : f32 to vector<16x8xf32>
    %94 = arith.maximumf %92, %93 : vector<16x8xf32>
    %c0_86 = arith.constant 0 : index
    %c0_87 = arith.constant 0 : index
    %c0_88 = arith.constant 0 : index
    %95 = vector.load %arg10[%c0_86, %c0_87, %c0_88] : memref<1x16x32xf32, #tpu.memory_space<vmem>>, vector<1x16x8xf32>
    %96 = vector.shape_cast %95 : vector<1x16x8xf32> to vector<16x8xf32>
    %97 = vector.shape_cast %11 : vector<16x8xf32> to vector<1x16x8xf32>
    tpu.vector_store %arg10[%c0_86, %c0_87, %c0_88], %97 {strides = array<i32>} : memref<1x16x32xf32, #tpu.memory_space<vmem>>, vector<1x16x8xf32>,
    %c0_89 = arith.constant 0 : index
    %c0_90 = arith.constant 0 : index
    %c8 = arith.constant 8 : index
    %98 = vector.load %arg10[%c0_89, %c0_90, %c8] : memref<1x16x32xf32, #tpu.memory_space<vmem>>, vector<1x16x8xf32>
    %99 = vector.shape_cast %98 : vector<1x16x8xf32> to vector<16x8xf32>
    %100 = vector.shape_cast %39 : vector<16x8xf32> to vector<1x16x8xf32>
    tpu.vector_store %arg10[%c0_89, %c0_90, %c8], %100 {strides = array<i32>} : memref<1x16x32xf32, #tpu.memory_space<vmem>>, vector<1x16x8xf32>,
    %c0_91 = arith.constant 0 : index
    %c0_92 = arith.constant 0 : index
    %c16 = arith.constant 16 : index
    %101 = vector.load %arg10[%c0_91, %c0_92, %c16] : memref<1x16x32xf32, #tpu.memory_space<vmem>>, vector<1x16x8xf32>
    %102 = vector.shape_cast %101 : vector<1x16x8xf32> to vector<16x8xf32>
    %103 = vector.shape_cast %75 : vector<16x8xf32> to vector<1x16x8xf32>
    tpu.vector_store %arg10[%c0_91, %c0_92, %c16], %103 {strides = array<i32>} : memref<1x16x32xf32, #tpu.memory_space<vmem>>, vector<1x16x8xf32>,
    %c0_93 = arith.constant 0 : index
    %c0_94 = arith.constant 0 : index
    %c24 = arith.constant 24 : index
    %104 = vector.load %arg10[%c0_93, %c0_94, %c24] : memref<1x16x32xf32, #tpu.memory_space<vmem>>, vector<1x16x8xf32>
    %105 = vector.shape_cast %104 : vector<1x16x8xf32> to vector<16x8xf32>
    %106 = vector.shape_cast %94 : vector<16x8xf32> to vector<1x16x8xf32>
    tpu.vector_store %arg10[%c0_93, %c0_94, %c24], %106 {strides = array<i32>} : memref<1x16x32xf32, #tpu.memory_space<vmem>>, vector<1x16x8xf32>,
    return
  }
  func.func @transform_0(%arg0: i32) -> (i32, i32, i32) {
    %c0_i32 = arith.constant 0 : i32
    %c0_i32_0 = arith.constant 0 : i32
    %c0_i32_1 = arith.constant 0 : i32
    return %arg0, %c0_i32, %c0_i32_0 : i32, i32, i32
  }
  func.func @transform_1(%arg0: i32) -> (i32, i32) {
    %c0_i32 = arith.constant 0 : i32
    %c0_i32_0 = arith.constant 0 : i32
    %c0_i32_1 = arith.constant 0 : i32
    return %c0_i32, %c0_i32_0 : i32, i32
  }
  func.func @transform_2(%arg0: i32) -> (i32, i32) {
    %c0_i32 = arith.constant 0 : i32
    %c0_i32_0 = arith.constant 0 : i32
    %c0_i32_1 = arith.constant 0 : i32
    return %c0_i32, %c0_i32_0 : i32, i32
  }
  func.func @transform_3(%arg0: i32) -> (i32, i32, i32) {
    %c0_i32 = arith.constant 0 : i32
    %c0_i32_0 = arith.constant 0 : i32
    %c0_i32_1 = arith.constant 0 : i32
    %c0_i32_2 = arith.constant 0 : i32
    return %c0_i32, %c0_i32_0, %c0_i32_1 : i32, i32, i32
  }
  func.func @transform_4(%arg0: i32) -> (i32, i32) {
    %c0_i32 = arith.constant 0 : i32
    %c0_i32_0 = arith.constant 0 : i32
    %c0_i32_1 = arith.constant 0 : i32
    return %c0_i32, %c0_i32_0 : i32, i32
  }
  func.func @transform_5(%arg0: i32) -> (i32, i32, i32) {
    %c0_i32 = arith.constant 0 : i32
    %c0_i32_0 = arith.constant 0 : i32
    %c0_i32_1 = arith.constant 0 : i32
    %c0_i32_2 = arith.constant 0 : i32
    return %c0_i32, %c0_i32_0, %c0_i32_1 : i32, i32, i32
  }
  func.func @transform_6(%arg0: i32) -> (i32, i32) {
    %c0_i32 = arith.constant 0 : i32
    %c0_i32_0 = arith.constant 0 : i32
    %c0_i32_1 = arith.constant 0 : i32
    return %c0_i32, %c0_i32_0 : i32, i32
  }
  func.func @transform_7(%arg0: i32) -> (i32, i32) {
    %c0_i32 = arith.constant 0 : i32
    %c0_i32_0 = arith.constant 0 : i32
    %c0_i32_1 = arith.constant 0 : i32
    return %c0_i32, %c0_i32_0 : i32, i32
  }
  func.func @transform_8(%arg0: i32) -> (i32, i32) {
    %c0_i32 = arith.constant 0 : i32
    %c0_i32_0 = arith.constant 0 : i32
    %c0_i32_1 = arith.constant 0 : i32
    return %c0_i32, %c0_i32_0 : i32, i32
  }
  func.func @transform_9(%arg0: i32) -> (i32, i32, i32) {
    %c0_i32 = arith.constant 0 : i32
    %c0_i32_0 = arith.constant 0 : i32
    %c0_i32_1 = arith.constant 0 : i32
    return %arg0, %c0_i32, %c0_i32_0 : i32, i32, i32
  }
}

</mosaic_0001>

<bundles_post_ra>
// kernel: tpu_custom_call.1
= control target key start
LH: loop header
LB: loop body
LE: loop exit
PB: predicated region body
PF: predicated region fallthrough
CT: control target
= control target key end

     0   :  { %14 = vsyncpa [#allocation6], 0  ;;  %s1911_s0 = inlined_call_operand.vmem [shape: f32[2,16,8], index: 0, kind: input, shape index: {}]   ;;  %s1912_s1 = inlined_call_operand.vmem [shape: f32[8,16], index: 1, kind: input, shape index: {}]   ;;  %s1913_s2 = inlined_call_operand.vmem [shape: f32[1,16], index: 2, kind: input, shape index: {}]   ;;  %s1914_s3 = inlined_call_operand.vmem [shape: f32[3,4,8], index: 3, kind: input, shape index: {}]   ;;  %s1915_s4 = inlined_call_operand.vmem [shape: f32[1,8], index: 4, kind: input, shape index: {}]   ;;  %s1916_s5 = inlined_call_operand.vmem [shape: f32[5,4,8], index: 5, kind: input, shape index: {}]   ;;  %s1917_s6 = inlined_call_operand.vmem [shape: f32[1,8], index: 6, kind: input, shape index: {}]   ;;  %s1918_s7 = inlined_call_operand.vmem [shape: f32[8,8], index: 7, kind: input, shape index: {}]   ;;  %s1919_s8 = inlined_call_operand.vmem [shape: f32[1,8], index: 8, kind: input, shape index: {}]   ;;  %s1920_s9 = inlined_call_operand.hbm [shape: f32[2,16,32], index: 9, kind: output, shape index: {}]  }
   0x1   :  { %16 = vsyncpa [#allocation6 + $0x1], 0  ;;  %s1701_s30 = smov 0   ;;  %s1703_s10 = smov 0  }
   0x2   :  { %s1705_s11 = smov 0   ;;  %s1707_s12 = smov 0  }
   0x3 LB: > { %s1722_s13 = sadd.s32 4294967295, %s1641_s12   ;;  %s1403_s14 = sadd.s32 4294967294, %s1641_s12   ;;  %s1641_s12 = sphi %s1707_s12, %s1926_s12   ;;  %s1637_s11 = sphi %s1705_s11, %s1925_s11   ;;  %s1633_s10 = sphi %s1703_s10, %s1924_s10   ;;  %s1629_s30 = sphi %s1701_s30, %s1923_s30  }
   0x4   : > { %s1726_s15 = sadd.s32 1, %s1641_s12   ;;  %s223_s16 = sadd.s32 1, %s1637_s11 }
   0x5   : > { %s220_s17 = ssub.s32 %s1641_s12, %s1726_s15  ;;  %p233_p0 = scmp.ne.s32.totalorder %s1637_s11, %s1633_s10 }
   0x6   : > { %p221_p1 = scmp.eq.s32.totalorder %s220_s17, 0  ;;  %p234_p2 = scmp.eq.s32.totalorder %s1722_s13, 1 }
   0x7   : > { %p239_p3 = scmp.ne.s32.totalorder %s1633_s10, %s1629_s30  ;;  %p240_p4 = scmp.eq.s32.totalorder %s1403_s14, 1 }
   0x8   : > { %s1737_s18 = scalar_select %p221_p1, %s1637_s11, %s223_s16  }
   0x9   : > { %p1739_p5 = por %p234_p2, %p233_p0  ;;  %p1743_p6 = por %p240_p4, %p239_p3 }
   0xa   : > { %p1406_p7 = scmp.ge.s32.totalorder %s1641_s12, 1  ;;  %p290_p8 = scmp.lt.s32.totalorder %s1641_s12, 3 }
   0xc   : > { %p291_p9 = pnand %p1406_p7, %p290_p8 }
   0xd   : > { %p326_p10 = scmp.lt.s32.totalorder (!%p291_p9), %s1722_s13, 1  ;;  %s323_s28 = sand.u32 (!%p291_p9), 1, %s1633_s10  }
   0xe   : > { %294 = sbr.rel (%p291_p9) target bundleno = 699 (0x2bb), region = 56  ;;  %s1407_s16 = sshll.u32 (!%p291_p9), %s323_s28, 4 }
   0xf   : > { %s1784_s26 = scalar_lea.vmem (!%p291_p9), [#allocation5], %s1407_s16  ;;  %s1645_s29 = smov (!%p291_p9), 120  }
  0x10   : > { %s1646_s22 = smov (!%p291_p9), 8   ;;  %s1648_s14 = smov (!%p291_p9), 24  }
  0x11   : > { %s1454_s17 = sshll.u32 (!%p291_p9), %s1722_s13, 8  ;;  %s1341_s16 = sshll.u32 (!%p291_p9), %s1784_s26, 4  ;;  %s1865_s16 = int_to_ptr.vmem [resolvable:$true] %s1341_s16 }
  0x12   : > { %s1581_s25 = scalar_lea.vmem (!%p291_p9), %s1865_s16, 256 }
  0x13   : > { %v333_v0 = vld [vmem:[%s1912_s1] sm:$0xff]  ;;  %s327_s23 = scalar_select %p326_p10, %s1722_s13, 1  ;;  %vm341_vm0 = vcmask 64512   ;;  %vm1187_vm1 = vcmask 57344   ;;  %vm1189_vm2 = vcmask 64519   ;;  %vm425_vm3 = vcmask 31744  }
  0x14   : > { %1485 = vmatprep.subr.mxu0 %v333_v0  ;;  %v1643_v3 = vmov 0.0   ;;  %vm719_vm4 = vcmask 27648   ;;  %vm428_vm5 = vcmask 25600   ;;  %v1410_v4 = vld [vmem:[%s1913_s2] ss:$0 sm:$0xff]  ;;  %vm453_vm6 = vcmask 1043456   ;;  %p1582_p11 = scmp.ne.s32.totalorder %s1865_s16, %s1581_s25 }
  0x15   : > { %1486 = vmatpush3.msra.mxu0 %v333_v0  ;;  %s1453_s24 = sshll.u32 %s327_s23, 4  ;;  %717 = vst.msk [vmem:[#allocation3] sm:$0xff] %vm425_vm3, %v1643_v3  ;;  %718 = vst.msk [vmem:[#allocation3 + $0x8] sm:$0xff] %vm425_vm3, %v1643_v3  ;;  %v1413_v8 = vld [vmem:[%s1914_s3 + $0x4] sm:$0xf]  ;;  %vm1302_vm7 = vcmask 130112  }
  0x16   : > { %s330_s27 = scalar_lea.vmem %s1911_s0, %s1453_s24  ;;  %426 = vst.msk [vmem:[#allocation2] sm:$0xff] %vm425_vm3, %v1643_v3  ;;  %427 = vst.msk [vmem:[#allocation2 + $0x8] sm:$0xff] %vm425_vm3, %v1643_v3  ;;  %v442_v9 = vld [vmem:[%s1914_s3] sm:$0xf]  ;;  %1490 = vmatprep.subr.msk.mxu1 %vm453_vm6, %v1413_v8  ;;  %v1420_v12 = vld [vmem:[%s1914_s3 + $0x8] sm:$0xf]  ;;  %s1862_s24 = scalar_lea.hbm %s1920_s9, %s1454_s17 }
  0x17   : > { %v331_v1 = vld [vmem:[%s330_s27] sm:$0xff]  ;;  %v332_v2 = vld [vmem:[%s330_s27 + $0x8] sm:$0xff]  ;;  %720 = vst.msk [vmem:[#allocation3 + $0x10] sm:$0xf] %vm719_vm4, %v1643_v3  ;;  %1495 = vmatprep.subr.msk.mxu0 %vm453_vm6, %v442_v9  ;;  %1491 = vmatpush3.msk.msra.mxu1 %vm453_vm6, %v1413_v8  ;;  %s1644_s27 = smov 116   ;;  %vm1313_vm8 = vcmask 195712   ;;  %p1583_p12 = pnand %p1582_p11, %p1739_p5 }
  0x18   : > { %1487 = vmatprep.mubr.msk.f32.mxu0 %vm341_vm0, %v331_v1  ;;  %1185 = vst.msk [vmem:[#allocation4 + $0x1] sm:$0xff] %vm341_vm0, %v331_v1  ;;  %1186 = vst.msk [vmem:[#allocation4 + $0x9] sm:$0xff] %vm341_vm0, %v332_v2  ;;  %1500 = vmatprep.subr.msk.mxu1 %vm453_vm6, %v1420_v12  ;;  %v1425_v14 = vld [vmem:[%s1916_s5 + $0x4] sm:$0xf]  ;;  %v731_v24 = vld [vmem:[%s1916_s5] sm:$0xf] }
  0x19   : > { %1188 = vst.msk [vmem:[#allocation4] sm:$0x1] %vm1187_vm1, %v331_v1  ;;  %1488 = vmatmul.mubr.msk.f32.vlgmr.msra.gmra.mxu0 %vm341_vm0, %v332_v2  ;;  %v1432_v25 = vld [vmem:[%s1916_s5 + $0x8] sm:$0xf]  ;;  %v1436_v32 = vld [vmem:[%s1916_s5 + $0xc] sm:$0xf]  ;;  %p1584_p13 = pneg %p1583_p12 }
  0x1a   : > { %1190 = vst.msk [vmem:[#allocation4 + $0xa] sm:$0x80] %vm1189_vm2, %v332_v2  ;;  %1496 = vmatpush3.msk.msra.mxu0 %vm453_vm6, %v442_v9  ;;  %v1440_v33 = vld [vmem:[%s1916_s5 + $0x10] sm:$0xf]  ;;  %v1201_v42 = vld [vmem:[%s1918_s7] sm:$0xff]  ;;  %vm1324_vm9 = vcmask 261312  }
  0x1b   : > { %429 = vst.msk [vmem:[#allocation2 + $0x10] sm:$0x3] %vm428_vm5, %v1643_v3  ;;  %1505 = vmatprep.subr.msk.mxu0 %vm453_vm6, %v1425_v14  ;;  %v1424_v56 = vld [vmem:[%s1915_s4] ss:$0 sm:$0xff]  ;;  %s1870_s13 = scalar_lea.sflag [#allocation6], %s323_s28 }
  0x1f   : > { %v1193_v28 = vld [vmem:[#allocation4 + $0x1] sm:$0xff]  ;;  %v1194_v37 = vld [vmem:[#allocation4 + $0x9] sm:$0xff] }
  0x20   : > { %v1191_v27 = vld [vmem:[#allocation4] sm:$0xff]  ;;  %v1192_v36 = vld [vmem:[#allocation4 + $0x8] sm:$0xff] }
  0x21   : > { %v1195_v35 = vmax.f32 %v1191_v27, %v1193_v28  ;;  %v1197_v38 = vld [vmem:[#allocation4 + $0x2] sm:$0xff]  ;;  %v1196_v43 = vmax.f32 %v1192_v36, %v1194_v37  ;;  %v1198_v46 = vld [vmem:[#allocation4 + $0xa] sm:$0xff] }
  0x23   : > { %v1199_v45 = vmax.f32 %v1195_v35, %v1197_v38  ;;  %v1200_v49 = vmax.f32 %v1196_v43, %v1198_v46 }
  0xd9   : > { %v1489_v5 = vpop.f32.mrf.mxu0 }
  0xda   : > { %v420_v6 = vadd.f32 %v1489_v5, %v1410_v4 }
  0xdb   : > { %v414_v7 = vpop.f32.mrf.mxu0 }
  0xdc   : > { %v424_v10 = vmax.f32 %v420_v6, 0.0  ;;  %v415_v11 = vadd.f32 %v1410_v4, %v414_v7 }
  0xde   : > { %1293 = vst.msk [vmem:[%s1784_s26 + $0x8] sm:$0xff] %vm341_vm0, %v424_v10  ;;  %v423_v13 = vmax.f32 %v415_v11, 0.0 }
  0xe0   : > { %1292 = vst.msk [vmem:[%s1784_s26] sm:$0xff] %vm341_vm0, %v423_v13  ;;  %721 = vrot.lane.b32.xlu1 %v423_v13, %s1644_s27  ;;  %432 = vrot.lane.b32.xlu0 %v423_v13, %s1645_s29 }
  0xe4   : > { %723 = vrot.lane.b32.xlu1 %v424_v10, %s1644_s27  ;;  %434 = vrot.lane.b32.xlu0 %v424_v10, %s1645_s29  ;;  %s1647_s29 = smov 16   ;;  %s1649_s27 = smov [#allocation5]  }
 0x152   : > { %v722_v15 = vpop.permute.xlu1 %721  ;;  %v433_v16 = vpop.permute.xlu0 %432 }
 0x153   : > { %727 = vst.msk [vmem:[#allocation3 + $0x2] sm:$0xff] %vm425_vm3, %v722_v15  ;;  %438 = vst.msk [vmem:[#allocation2 + $0x1] sm:$0xff] %vm425_vm3, %v433_v16  ;;  %v1445_v16 = vld [vmem:[%s1919_s8] ss:$0 sm:$0xff] }
 0x156   : > { %v724_v17 = vpop.permute.xlu1 %723  ;;  %v435_v18 = vpop.permute.xlu0 %434 }
 0x157   : > { %728 = vst.msk [vmem:[#allocation3 + $0xa] sm:$0xff] %vm425_vm3, %v724_v17  ;;  %439 = vst.msk [vmem:[#allocation2 + $0x9] sm:$0xff] %vm425_vm3, %v435_v18 }
 0x15a   : > { %v443_v19 = vld [vmem:[#allocation2 + $0x1] sm:$0xff]  ;;  %v732_v26 = vld [vmem:[#allocation3 + $0x1] sm:$0xff] }
 0x15b   : > { %v440_v20 = vld [vmem:[#allocation2] sm:$0xff]  ;;  %1492 = vmatprep.mubr.msk.f32.mxu1 %vm425_vm3, %v443_v19  ;;  %v729_v31 = vld [vmem:[#allocation3] sm:$0xff] }
 0x15c   : > { %1497 = vmatprep.mubr.msk.f32.mxu0 %vm425_vm3, %v440_v20  ;;  %v904_v34 = vld [vmem:[#allocation3 + $0x2] sm:$0xff] }
 0x15e   : > { %v444_v21 = vld [vmem:[#allocation2 + $0x9] sm:$0xff]  ;;  %v733_v30 = vld [vmem:[#allocation3 + $0x9] sm:$0xff] }
 0x15f   : > { %v441_v22 = vld [vmem:[#allocation2 + $0x8] sm:$0xff]  ;;  %1493 = vmatmul.mubr.msk.f32.vlgmr.msra.gmra.mxu1 %vm425_vm3, %v444_v21  ;;  %v730_v39 = vld [vmem:[#allocation3 + $0x8] sm:$0xff] }
 0x160   : > { %v616_v23 = vld [vmem:[#allocation2 + $0x2] sm:$0xff]  ;;  %1498 = vmatmul.mubr.msk.f32.vlgmr.msra.gmra.mxu0 %vm425_vm3, %v441_v22  ;;  %1501 = vmatpush3.msk.msra.mxu1 %vm453_vm6, %v1420_v12  ;;  %v617_v29 = vld [vmem:[#allocation2 + $0xa] sm:$0xff] }
 0x161   : > { %1502 = vmatprep.mubr.msk.f32.mxu1 %vm425_vm3, %v616_v23  ;;  %1507 = vmatprep.mubr.msk.f32.mxu0 %vm425_vm3, %v732_v26  ;;  %v905_v40 = vld [vmem:[#allocation3 + $0xa] sm:$0xff] }
 0x162   : > { %1506 = vmatpush3.msk.msra.mxu0 %vm453_vm6, %v1425_v14  ;;  %1510 = vmatprep.subr.msk.mxu1 %vm453_vm6, %v731_v24  ;;  %v994_v41 = vld [vmem:[#allocation3 + $0x3] sm:$0xff]  ;;  %v995_v47 = vld [vmem:[#allocation3 + $0xb] sm:$0xff] }
 0x163   : > { %1515 = vmatprep.subr.msk.mxu0 %vm453_vm6, %v1432_v25  ;;  %1503 = vmatmul.mubr.msk.f32.vlgmr.msra.gmra.mxu1 %vm425_vm3, %v617_v29  ;;  %v1084_v44 = vld [vmem:[#allocation3 + $0x4] sm:$0xff]  ;;  %v1085_v48 = vld [vmem:[#allocation3 + $0xc] sm:$0xff] }
 0x164   : > { %1508 = vmatmul.mubr.msk.f32.vlgmr.msra.gmra.mxu0 %vm425_vm3, %v733_v30  ;;  %1511 = vmatpush3.msk.msra.mxu1 %vm453_vm6, %v731_v24  ;;  %v1444_v14 = vld [vmem:[%s1917_s6] ss:$0 sm:$0xff] }
 0x165   : > { %1512 = vmatprep.mubr.msk.f32.mxu1 %vm425_vm3, %v729_v31  ;;  %1517 = vmatprep.mubr.msk.f32.mxu0 %vm425_vm3, %v904_v34 }
 0x166   : > { %1516 = vmatpush3.msk.msra.mxu0 %vm453_vm6, %v1432_v25  ;;  %1520 = vmatprep.subr.msk.mxu1 %vm453_vm6, %v1436_v32 }
 0x167   : > { %1525 = vmatprep.subr.msk.mxu0 %vm453_vm6, %v1440_v33  ;;  %1513 = vmatmul.mubr.msk.f32.vlgmr.msra.gmra.mxu1 %vm425_vm3, %v730_v39 }
 0x168   : > { %1518 = vmatmul.mubr.msk.f32.vlgmr.msra.gmra.mxu0 %vm425_vm3, %v905_v40  ;;  %1521 = vmatpush3.msk.msra.mxu1 %vm453_vm6, %v1436_v32 }
 0x169   : > { %1522 = vmatprep.mubr.msk.f32.mxu1 %vm425_vm3, %v994_v41  ;;  %1527 = vmatprep.mubr.msk.f32.mxu0 %vm425_vm3, %v1084_v44 }
 0x16a   : > { %1526 = vmatpush3.msk.msra.mxu0 %vm453_vm6, %v1440_v33  ;;  %1530 = vmatprep.subr.mxu1 %v1201_v42 }
 0x16b   : > { %1523 = vmatmul.mubr.msk.f32.vlgmr.msra.gmra.mxu1 %vm425_vm3, %v995_v47 }
 0x16c   : > { %1528 = vmatmul.mubr.msk.f32.vlgmr.msra.gmra.mxu0 %vm425_vm3, %v1085_v48  ;;  %1531 = vmatpush3.msra.mxu1 %v1201_v42 }
 0x16d   : > { %1532 = vmatprep.mubr.msk.f32.mxu1 %vm341_vm0, %v1199_v45 }
 0x16f   : > { %1533 = vmatmul.mubr.msk.f32.vlgmr.msra.gmra.mxu1 %vm341_vm0, %v1200_v49 }
 0x21f   : > { %v1494_v50 = vpop.f32.mrf.mxu1 }
 0x220   : > { %v1499_v51 = vpop.f32.mrf.mxu0 }
 0x221   : > { %v523_v52 = vpop.f32.mrf.mxu1  ;;  %v613_v54 = vadd.f32 %v1499_v51, %v1494_v50 }
 0x222   : > { %v607_v53 = vpop.f32.mrf.mxu0 }
 0x223   : > { %v1504_v55 = vpop.f32.mrf.mxu1  ;;  %v608_v58 = vadd.f32 %v607_v53, %v523_v52 }
 0x224   : > { %v1509_v57 = vpop.f32.mrf.mxu0  ;;  %v705_v59 = vadd.f32 %v1504_v55, %v613_v54 }
 0x225   : > { %v695_v60 = vpop.f32.mrf.mxu1 }
 0x226   : > { %v811_v61 = vpop.f32.mrf.mxu0  ;;  %v714_v62 = vadd.f32 %v1424_v56, %v705_v59  ;;  %v704_v63 = vadd.f32 %v695_v60, %v608_v58 }
 0x227   : > { %v1514_v0 = vpop.f32.mrf.mxu1 }
 0x228   : > { %v1519_v1 = vpop.f32.mrf.mxu0  ;;  %v716_v2 = vmax.f32 %v714_v62, 0.0  ;;  %v713_v3 = vadd.f32 %v1424_v56, %v704_v63  ;;  %v901_v4 = vadd.f32 %v1514_v0, %v1509_v57 }
 0x229   : > { %v895_v5 = vpop.f32.mrf.mxu1 }
 0x22a   : > { %v983_v6 = vpop.f32.mrf.mxu0  ;;  %v715_v7 = vmax.f32 %v713_v3, 0.0  ;;  %v993_v8 = vadd.f32 %v1519_v1, %v901_v4  ;;  %v896_v9 = vadd.f32 %v895_v5, %v811_v61  ;;  %1298 = vrot.lane.b32.xlu1 %v716_v2, %s1646_s22 }
 0x22b   : > { %v1524_v10 = vpop.f32.mrf.mxu1 }
 0x22c   : > { %v1529_v11 = vpop.f32.mrf.mxu0  ;;  %v992_v12 = vadd.f32 %v983_v6, %v896_v9  ;;  %v1083_v13 = vadd.f32 %v1524_v10, %v993_v8  ;;  %1296 = vrot.lane.b32.xlu0 %v715_v7, %s1646_s22 }
 0x22d   : > { %v1073_v15 = vpop.f32.mrf.mxu1 }
 0x22e   : > { %v1173_v17 = vadd.f32 %v1529_v11, %v1083_v13  ;;  %v1082_v18 = vadd.f32 %v1073_v15, %v992_v12  ;;  %v1163_v19 = vpop.f32.mrf.mxu0 }
 0x22f   : > { %v1534_v20 = vpop.f32.mrf.mxu1 }
 0x230   : > { %v1182_v21 = vadd.f32 %v1444_v14, %v1173_v17  ;;  %v1172_v22 = vadd.f32 %v1163_v19, %v1082_v18  ;;  %v1287_v23 = vadd.f32 %v1534_v20, %v1445_v16 }
 0x231   : > { %v1281_v24 = vpop.f32.mrf.mxu1 }
 0x232   : > { %v1184_v25 = vmax.f32 %v1182_v21, 0.0  ;;  %v1181_v26 = vadd.f32 %v1444_v14, %v1172_v22  ;;  %v1291_v28 = vmax.f32 %v1287_v23, 0.0  ;;  %v1282_v29 = vadd.f32 %v1445_v16, %v1281_v24 }
 0x234   : > { %v1183_v27 = vmax.f32 %v1181_v26, 0.0  ;;  %1309 = vrot.lane.b32.xlu1 %v1184_v25, %s1647_s29  ;;  %v1290_v30 = vmax.f32 %v1282_v29, 0.0 }
 0x236   : > { %1307 = vrot.lane.b32.xlu0 %v1183_v27, %s1647_s29  ;;  %s1585_s29 = sshll.u32 %s1649_s27, 4  ;;  %s1586_s29 = int_to_ptr.vmem [resolvable:$false] %s1585_s29 }
 0x237   : > { %p1588_p0 = scmp.lt.s32.totalorder %s1865_s16, %s1586_s29 }
 0x238   : > { %1320 = vrot.lane.b32.xlu1 %v1291_v28, %s1648_s14 }
 0x23a   : > { %1318 = vrot.lane.b32.xlu0 %v1290_v30, %s1648_s14  ;;  %s1587_s14 = scalar_lea.vmem %s1586_s29, 512 }
 0x23b   : > { %p1589_p1 = scmp.lt.s32.totalorder %s1587_s14, %s1581_s25 }
 0x23d   : > { %p1590_p2 = por %p1589_p1, %p1588_p0 }
 0x23f   : > { %p1591_p3 = pnand %p1590_p2, %p1584_p13 }
 0x29c   : > { %v1299_v31 = vpop.permute.xlu1 %1298 }
 0x29d   : > { %1304 = vst.msk [vmem:[%s1784_s26 + $0x8] sm:$0xff] %vm1302_vm7, %v1299_v31 }
 0x29e   : > { %v1297_v32 = vpop.permute.xlu0 %1296 }
 0x29f   : > { %1303 = vst.msk [vmem:[%s1784_s26] sm:$0xff] %vm1302_vm7, %v1297_v32 }
 0x2a6   : > { %v1310_v33 = vpop.permute.xlu1 %1309 }
 0x2a7   : > { %1315 = vst.msk [vmem:[%s1784_s26 + $0x8] sm:$0xff] %vm1313_vm8, %v1310_v33 }
 0x2a8   : > { %v1308_v34 = vpop.permute.xlu0 %1307 }
 0x2a9   : > { %1314 = vst.msk [vmem:[%s1784_s26] sm:$0xff] %vm1313_vm8, %v1308_v34 }
 0x2aa   : > { %v1321_v35 = vpop.permute.xlu1 %1320 }
 0x2ab   : > { %1326 = vst.msk [vmem:[%s1784_s26 + $0x8] sm:$0xff] %vm1324_vm9, %v1321_v35 }
 0x2ac   : > { %v1319_v36 = vpop.permute.xlu0 %1318 }
 0x2ad   : > { %1325 = vst.msk [vmem:[%s1784_s26] sm:$0xff] %vm1324_vm9, %v1319_v36 }
 0x2ae   : > { %1594 = shalt.err (!%p1591_p3)
}
 0x2af   : > { %s1595_s28 = scalar_lea.hbm %s1862_s24, 256  ;;  %s1599_s21 = scalar_lea.hbm %s1920_s9, 512 }
 0x2b0   : > { %p1596_p4 = scmp.ne.s32.totalorder %s1862_s24, %s1595_s28  ;;  %p1600_p9 = scmp.lt.s32.totalorder %s1862_s24, %s1920_s9 }
 0x2b1   : > { %p1601_p10 = scmp.lt.s32.totalorder %s1599_s21, %s1595_s28 }
 0x2b2   : > { %p1597_p7 = pnand %p1596_p4, %p1739_p5 }
 0x2b3   : > { %p1602_p11 = por %p1601_p10, %p1600_p9 }
 0x2b4   : > { %p1598_p8 = pneg %p1597_p7 }
 0x2b6   : > { %p1603_p12 = pnand %p1602_p11, %p1598_p8 }
 0x2b8   : > { %1606 = shalt.err (!%p1603_p12)
}
 0x2b9   : > { %s1650_s25 = smov 128  }
 0x2ba   : > { %1535 = dma.vmem_to_hbm [thread:$0]  (%p1739_p5), %s1865_s16, 256, %s1862_s24, %s1870_s13, %s1650_s25, %s1650_s25, %s1646_s22  }
 0x2bb PF: > { %p1541_p13 = scmp.ge.s32.totalorder %s1641_s12, 2  ;;  %s1356_s29 = sand.u32 1, %s1629_s30  }
 0x2bc   : > { %s1357_s14 = scalar_lea.sflag [#allocation6], %s1356_s29 }
 0x2bd   : > { %p1538_p0 = pnand %p1541_p13, %p1743_p6 }
 0x2bf   : > { %p1539_p1 = pneg %p1538_p0 }
 0x2c1   : > { %1624 = dma.done.wait (%p1539_p1), %s1357_s14, 256  }
 0x2c2   : > { %1626 = vsyncadd (%p1539_p1), %s1357_s14, 4294967040  ;;  %p19_p2 = scmp.ge.s32.totalorder %s1726_s15, 4   ;;  %s1923_s30 = smov %s1633_s10 }
 0x2c3   : > { %s1924_s10 = smov %s1637_s11  ;;  %s1925_s11 = smov %s1737_s18 }
 0x2c4   : > { %s1926_s12 = smov %s1726_s15  ;;  %21 = sbr.rel (!%p19_p2) target bundleno = 3 (0x3), region = 97 }
 0x2c9   :  { %1362 = vsyncpa [#allocation6], 1 }
 0x2ca   :  { %1364 = vsyncpa [#allocation6 + $0x1], 1 }

</bundles_post_ra>
